<compile_context>
chip_gen: v5e
topology: v5e:2x2
jax: 0.10.0
libtpu: 0.0.40
codegen_flags: <defaults>
</compile_context>

<pallas_src>
import functools

import jax
import jax.numpy as jnp
from jax.experimental import pallas as pl
from jax.experimental.pallas import tpu as pltpu

_LANES = 128


def _round_up(n, m):
    return (n + m - 1) // m * m


# ----------------------------------------------------------------------------
# Fused kernels: conv (single im2col matmul) + ReLU + GAP + classifier head
# ----------------------------------------------------------------------------
def _features(p_ref, wc_ref, bc_ref):
    """im2col conv (one K=9*Cin MXU matmul) + bias + ReLU + global avg pool.

    Conv output channels are pre-padded to 128 in the wrapper, so the biggest
    intermediate (bb*H*W, Cout) and the pooled features are lane-dense.
    """
    p = p_ref[...]                                   # (bb, H*W, 9*Cin)
    bb, hw, k = p.shape
    wc = wc_ref[...]                                 # (9*Cin, Cout_pad=128)
    cp = wc.shape[-1]
    a = jnp.dot(p.reshape(bb * hw, k), wc,
                preferred_element_type=jnp.float32)  # (bb*H*W, 128)
    a = jnp.maximum(a + bc_ref[...], 0.0)            # bias + ReLU (VPU)
    # global average pool over the spatial extent -> (bb, 128)
    return jnp.mean(a.reshape(bb, hw, cp), axis=1)


def _mlp_fused_kernel(p_ref, wc_ref, bc_ref, w1_ref, b1_ref, w2_ref, b2_ref,
                      w3_ref, b3_ref, o_ref):
    """features + clf head: Linear->ReLU->Linear->ReLU->Linear (lane-padded)."""
    feats = _features(p_ref, wc_ref, bc_ref)
    h = jnp.dot(feats, w1_ref[...], preferred_element_type=jnp.float32)
    h = jnp.maximum(h + b1_ref[...], 0.0)
    h = jnp.dot(h, w2_ref[...], preferred_element_type=jnp.float32)
    h = jnp.maximum(h + b2_ref[...], 0.0)
    h = jnp.dot(h, w3_ref[...], preferred_element_type=jnp.float32)
    o_ref[...] = h + b3_ref[...]


def _fc_fused_kernel(p_ref, wc_ref, bc_ref, wfc_ref, o_ref):
    """features + fc head: bias-free Linear (lane-padded to 128 classes)."""
    feats = _features(p_ref, wc_ref, bc_ref)
    o_ref[...] = jnp.dot(feats, wfc_ref[...],
                         preferred_element_type=jnp.float32)


def _fused_call(kernel, patches, weights, out_cols):
    B, hw, k = patches.shape
    block_b = B if B <= 8 else 8                     # batch tile for the grid

    def _full(a):                                    # resident whole weight
        return pl.BlockSpec(a.shape, lambda i: (0,) * a.ndim)

    return pl.pallas_call(
        kernel,
        grid=(pl.cdiv(B, block_b),),
        in_specs=[pl.BlockSpec((block_b, hw, k), lambda i: (i, 0, 0))]
                 + [_full(w) for w in weights],
        out_specs=pl.BlockSpec((block_b, out_cols), lambda i: (i, 0)),
        out_shape=jax.ShapeDtypeStruct((B, out_cols), jnp.float32),
        compiler_params=pltpu.CompilerParams(
            dimension_semantics=("parallel",),
            vmem_limit_bytes=32 * 1024 * 1024),
    )(patches, *weights)


# ----------------------------------------------------------------------------
# Parameter init (deterministic, mirrors PyTorch module shapes)
# ----------------------------------------------------------------------------
def init_params(key, c_in=4, feat_dim=64, neurons=32, n_classes=100):
    ks = jax.random.split(key, 9)

    def kaiming(k, shape, fan_in):
        return jax.random.normal(k, shape, jnp.float32) * jnp.sqrt(2.0 / fan_in)

    def torch_linear(kw, kb, fan_in, fan_out):
        bound = 1.0 / jnp.sqrt(fan_in)
        w = jax.random.uniform(kw, (fan_in, fan_out), jnp.float32, -bound, bound)
        b = jax.random.uniform(kb, (1, fan_out), jnp.float32, -bound, bound)
        return w, b

    params = {}
    # synthetic feature extractor: conv 3x3, c_in -> feat_dim
    params["conv_w"] = kaiming(ks[0], (3, 3, c_in, feat_dim), 9 * c_in)
    params["conv_b"] = jnp.zeros((1, feat_dim), jnp.float32)
    # fc head: Linear(feat_dim, 100, bias=False), kaiming_normal_ init
    params["fc_w"] = kaiming(ks[1], (feat_dim, n_classes), feat_dim)
    # clf MLP head: 64 -> neurons -> neurons -> 100
    params["w1"], params["b1"] = torch_linear(ks[2], ks[3], feat_dim, neurons)
    params["w2"], params["b2"] = torch_linear(ks[4], ks[5], neurons, neurons)
    params["w3"], params["b3"] = torch_linear(ks[6], ks[7], neurons, n_classes)
    return params


# ----------------------------------------------------------------------------
# Forward (wrapper == Network.forward)
# ----------------------------------------------------------------------------
def _im2col(x_nhwc):
    """3x3 / pad=1 patches: (B,H,W,C) -> (B, H*W, 9*C).

    Layout plumbing only (pad + shifted slices + concat fuse into one XLA op);
    all FLOPs stay inside the fused Pallas kernel as a single K=9*C matmul."""
    B, H, W, C = x_nhwc.shape
    xp = jnp.pad(x_nhwc, ((0, 0), (1, 1), (1, 1), (0, 0)))
    cols = [xp[:, dy:dy + H, dx:dx + W, :]
            for dy in range(3) for dx in range(3)]
    return jnp.concatenate(cols, axis=-1).reshape(B, H * W, 9 * C)


def _pad_to(a, shape):
    return jnp.pad(a, [(0, t - s) for s, t in zip(a.shape, shape)])


@functools.partial(jax.jit, static_argnames=("classifier",))
def network_forward(x_nchw, params, classifier="MLP"):
    # NCHW -> NHWC + im2col patch extraction (glue; compute is in-kernel).
    x = jnp.transpose(x_nchw, (0, 2, 3, 1)).astype(jnp.float32)
    B, H, W, C = x.shape
    patches = _im2col(x)

    feat_dim = params["conv_w"].shape[-1]
    f_pad = _round_up(feat_dim, _LANES)              # lane-dense features (64->128)
    wc = _pad_to(params["conv_w"].reshape(9 * C, feat_dim), (9 * C, f_pad))
    bc = _pad_to(params["conv_b"], (1, f_pad))       # zero-pad: ReLU(0)=0 -> exact

    n_classes = params["fc_w"].shape[-1]
    n_pad = _round_up(n_classes, _LANES)             # lane-dense output (100->128)

    if classifier == "MLP":
        neurons = params["w1"].shape[-1]
        h_pad = _round_up(neurons, _LANES)           # lane-dense hidden (32->128)
        w1 = _pad_to(params["w1"], (f_pad, h_pad))   # padded rows are zero
        b1 = _pad_to(params["b1"], (1, h_pad))
        w2 = _pad_to(params["w2"], (h_pad, h_pad))
        b2 = _pad_to(params["b2"], (1, h_pad))
        w3 = _pad_to(params["w3"], (h_pad, n_pad))
        b3 = _pad_to(params["b3"], (1, n_pad))
        out = _fused_call(_mlp_fused_kernel, patches,
                          (wc, bc, w1, b1, w2, b2, w3, b3), n_pad)
    else:
        wfc = _pad_to(params["fc_w"], (f_pad, n_pad))
        out = _fused_call(_fc_fused_kernel, patches, (wc, bc, wfc), n_pad)

    return out[:, :n_classes]                        # drop the zero lane padding


# ----------------------------------------------------------------------------
if __name__ == "__main__":
    key = jax.random.PRNGKey(0)
    k_x, k_p = jax.random.split(key)

    B, C, H, W = 2, 4, 16, 16          # small NCHW input, matches PyTorch side
    x = jax.random.normal(k_x, (B, C, H, W), jnp.float32)
    params = init_params(k_p, c_in=C, feat_dim=64, neurons=32, n_classes=100)

    out_mlp = network_forward(x, params, classifier="MLP")
    out_fc = network_forward(x, params, classifier="FC")
    jax.block_until_ready(out_mlp)
    jax.block_until_ready(out_fc)

    assert out_mlp.shape == (B, 100) and out_fc.shape == (B, 100)
    assert bool(jnp.all(jnp.isfinite(out_mlp))) and bool(jnp.all(jnp.isfinite(out_fc)))
    print("KERNEL_OK")
</pallas_src>

<mosaic_0001>
module attributes {stable_mosaic.version = 11 : i64} {
  func.func @_mlp_fused_kernel(%arg0: i32, %arg1: memref<2x256x36xf32, #tpu.memory_space<vmem>>, %arg2: memref<36x128xf32, #tpu.memory_space<vmem>>, %arg3: memref<1x128xf32, #tpu.memory_space<vmem>>, %arg4: memref<128x128xf32, #tpu.memory_space<vmem>>, %arg5: memref<1x128xf32, #tpu.memory_space<vmem>>, %arg6: memref<128x128xf32, #tpu.memory_space<vmem>>, %arg7: memref<1x128xf32, #tpu.memory_space<vmem>>, %arg8: memref<128x128xf32, #tpu.memory_space<vmem>>, %arg9: memref<1x128xf32, #tpu.memory_space<vmem>>, %arg10: memref<2x128xf32, #tpu.memory_space<vmem>>) attributes {dimension_semantics = [#tpu.dimension_semantics<parallel>], iteration_bounds = array<i64: 1>, scalar_prefetch = 0 : i64, scratch_operands = 0 : i64, tpu.core_type = #tpu.core_type<tc>, window_params = [{transform_indices = @transform_0, window_bounds = array<i64: 2, 256, 36>}, {pipeline_mode = #tpu.pipeline_mode<synchronous>, transform_indices = @transform_1, window_bounds = array<i64: 36, 128>}, {pipeline_mode = #tpu.pipeline_mode<synchronous>, transform_indices = @transform_2, window_bounds = array<i64: 1, 128>}, {pipeline_mode = #tpu.pipeline_mode<synchronous>, transform_indices = @transform_3, window_bounds = array<i64: 128, 128>}, {pipeline_mode = #tpu.pipeline_mode<synchronous>, transform_indices = @transform_4, window_bounds = array<i64: 1, 128>}, {pipeline_mode = #tpu.pipeline_mode<synchronous>, transform_indices = @transform_5, window_bounds = array<i64: 128, 128>}, {pipeline_mode = #tpu.pipeline_mode<synchronous>, transform_indices = @transform_6, window_bounds = array<i64: 1, 128>}, {pipeline_mode = #tpu.pipeline_mode<synchronous>, transform_indices = @transform_7, window_bounds = array<i64: 128, 128>}, {pipeline_mode = #tpu.pipeline_mode<synchronous>, transform_indices = @transform_8, window_bounds = array<i64: 1, 128>}, {transform_indices = @transform_9, window_bounds = array<i64: 2, 128>}]} {
    %c0 = arith.constant 0 : index
    %c0_0 = arith.constant 0 : index
    %c0_1 = arith.constant 0 : index
    %0 = vector.load %arg1[%c0, %c0_0, %c0_1] : memref<2x256x36xf32, #tpu.memory_space<vmem>>, vector<2x256x36xf32>
    %c0_2 = arith.constant 0 : index
    %c0_3 = arith.constant 0 : index
    %1 = vector.load %arg2[%c0_2, %c0_3] : memref<36x128xf32, #tpu.memory_space<vmem>>, vector<36x128xf32>
    %2 = vector.shape_cast %0 : vector<2x256x36xf32> to vector<512x36xf32>
    %cst = arith.constant dense<0.000000e+00> : vector<512x128xf32>
    %3 = tpu.matmul %2, %1, %cst {dimension_numbers = #tpu.dot_dimension_numbers<[1], [0], [0], [1], [0, 0, 1, 1], [], []>} : vector<512x36xf32>, vector<36x128xf32>, vector<512x128xf32> -> vector<512x128xf32>
    %c0_4 = arith.constant 0 : index
    %c0_5 = arith.constant 0 : index
    %4 = vector.load %arg3[%c0_4, %c0_5] : memref<1x128xf32, #tpu.memory_space<vmem>>, vector<1x128xf32>
    %5 = vector.broadcast %4 : vector<1x128xf32> to vector<512x128xf32>
    %6 = arith.addf %3, %5 : vector<512x128xf32>
    %cst_6 = arith.constant 0.000000e+00 : f32
    %7 = vector.broadcast %cst_6 : f32 to vector<512x128xf32>
    %8 = arith.maximumf %6, %7 : vector<512x128xf32>
    %9 = vector.shape_cast %8 : vector<512x128xf32> to vector<2x256x128xf32>
    %cst_7 = arith.constant dense<0.000000e+00> : vector<2x128xf32>
    %10 = vector.multi_reduction <add>, %9, %cst_7 [1] : vector<2x256x128xf32> to vector<2x128xf32>
    %cst_8 = arith.constant 2.560000e+02 : f32
    %11 = vector.broadcast %cst_8 : f32 to vector<2x128xf32>
    %12 = arith.divf %10, %11 : vector<2x128xf32>
    %c0_9 = arith.constant 0 : index
    %c0_10 = arith.constant 0 : index
    %13 = vector.load %arg4[%c0_9, %c0_10] : memref<128x128xf32, #tpu.memory_space<vmem>>, vector<128x128xf32>
    %cst_11 = arith.constant dense<0.000000e+00> : vector<2x128xf32>
    %14 = tpu.matmul %12, %13, %cst_11 {dimension_numbers = #tpu.dot_dimension_numbers<[1], [0], [0], [1], [0, 0, 1, 1], [], []>} : vector<2x128xf32>, vector<128x128xf32>, vector<2x128xf32> -> vector<2x128xf32>
    %c0_12 = arith.constant 0 : index
    %c0_13 = arith.constant 0 : index
    %15 = vector.load %arg5[%c0_12, %c0_13] : memref<1x128xf32, #tpu.memory_space<vmem>>, vector<1x128xf32>
    %16 = vector.broadcast %15 : vector<1x128xf32> to vector<2x128xf32>
    %17 = arith.addf %14, %16 : vector<2x128xf32>
    %cst_14 = arith.constant 0.000000e+00 : f32
    %18 = vector.broadcast %cst_14 : f32 to vector<2x128xf32>
    %19 = arith.maximumf %17, %18 : vector<2x128xf32>
    %c0_15 = arith.constant 0 : index
    %c0_16 = arith.constant 0 : index
    %20 = vector.load %arg6[%c0_15, %c0_16] : memref<128x128xf32, #tpu.memory_space<vmem>>, vector<128x128xf32>
    %cst_17 = arith.constant dense<0.000000e+00> : vector<2x128xf32>
    %21 = tpu.matmul %19, %20, %cst_17 {dimension_numbers = #tpu.dot_dimension_numbers<[1], [0], [0], [1], [0, 0, 1, 1], [], []>} : vector<2x128xf32>, vector<128x128xf32>, vector<2x128xf32> -> vector<2x128xf32>
    %c0_18 = arith.constant 0 : index
    %c0_19 = arith.constant 0 : index
    %22 = vector.load %arg7[%c0_18, %c0_19] : memref<1x128xf32, #tpu.memory_space<vmem>>, vector<1x128xf32>
    %23 = vector.broadcast %22 : vector<1x128xf32> to vector<2x128xf32>
    %24 = arith.addf %21, %23 : vector<2x128xf32>
    %cst_20 = arith.constant 0.000000e+00 : f32
    %25 = vector.broadcast %cst_20 : f32 to vector<2x128xf32>
    %26 = arith.maximumf %24, %25 : vector<2x128xf32>
    %c0_21 = arith.constant 0 : index
    %c0_22 = arith.constant 0 : index
    %27 = vector.load %arg8[%c0_21, %c0_22] : memref<128x128xf32, #tpu.memory_space<vmem>>, vector<128x128xf32>
    %cst_23 = arith.constant dense<0.000000e+00> : vector<2x128xf32>
    %28 = tpu.matmul %26, %27, %cst_23 {dimension_numbers = #tpu.dot_dimension_numbers<[1], [0], [0], [1], [0, 0, 1, 1], [], []>} : vector<2x128xf32>, vector<128x128xf32>, vector<2x128xf32> -> vector<2x128xf32>
    %c0_24 = arith.constant 0 : index
    %c0_25 = arith.constant 0 : index
    %29 = vector.load %arg9[%c0_24, %c0_25] : memref<1x128xf32, #tpu.memory_space<vmem>>, vector<1x128xf32>
    %30 = vector.broadcast %29 : vector<1x128xf32> to vector<2x128xf32>
    %31 = arith.addf %28, %30 : vector<2x128xf32>
    %c0_26 = arith.constant 0 : index
    %c0_27 = arith.constant 0 : index
    %32 = vector.load %arg10[%c0_26, %c0_27] : memref<2x128xf32, #tpu.memory_space<vmem>>, vector<2x128xf32>
    tpu.vector_store %arg10[%c0_26, %c0_27], %31 {strides = array<i32>} : memref<2x128xf32, #tpu.memory_space<vmem>>, vector<2x128xf32>,
    return
  }
  func.func @transform_0(%arg0: i32) -> (i32, i32, i32) {
    %c0_i32 = arith.constant 0 : i32
    %c0_i32_0 = arith.constant 0 : i32
    %c0_i32_1 = arith.constant 0 : i32
    return %arg0, %c0_i32, %c0_i32_0 : i32, i32, i32
  }
  func.func @transform_1(%arg0: i32) -> (i32, i32) {
    %c0_i32 = arith.constant 0 : i32
    %c0_i32_0 = arith.constant 0 : i32
    %c0_i32_1 = arith.constant 0 : i32
    return %c0_i32, %c0_i32_0 : i32, i32
  }
  func.func @transform_2(%arg0: i32) -> (i32, i32) {
    %c0_i32 = arith.constant 0 : i32
    %c0_i32_0 = arith.constant 0 : i32
    %c0_i32_1 = arith.constant 0 : i32
    return %c0_i32, %c0_i32_0 : i32, i32
  }
  func.func @transform_3(%arg0: i32) -> (i32, i32) {
    %c0_i32 = arith.constant 0 : i32
    %c0_i32_0 = arith.constant 0 : i32
    %c0_i32_1 = arith.constant 0 : i32
    return %c0_i32, %c0_i32_0 : i32, i32
  }
  func.func @transform_4(%arg0: i32) -> (i32, i32) {
    %c0_i32 = arith.constant 0 : i32
    %c0_i32_0 = arith.constant 0 : i32
    %c0_i32_1 = arith.constant 0 : i32
    return %c0_i32, %c0_i32_0 : i32, i32
  }
  func.func @transform_5(%arg0: i32) -> (i32, i32) {
    %c0_i32 = arith.constant 0 : i32
    %c0_i32_0 = arith.constant 0 : i32
    %c0_i32_1 = arith.constant 0 : i32
    return %c0_i32, %c0_i32_0 : i32, i32
  }
  func.func @transform_6(%arg0: i32) -> (i32, i32) {
    %c0_i32 = arith.constant 0 : i32
    %c0_i32_0 = arith.constant 0 : i32
    %c0_i32_1 = arith.constant 0 : i32
    return %c0_i32, %c0_i32_0 : i32, i32
  }
  func.func @transform_7(%arg0: i32) -> (i32, i32) {
    %c0_i32 = arith.constant 0 : i32
    %c0_i32_0 = arith.constant 0 : i32
    %c0_i32_1 = arith.constant 0 : i32
    return %c0_i32, %c0_i32_0 : i32, i32
  }
  func.func @transform_8(%arg0: i32) -> (i32, i32) {
    %c0_i32 = arith.constant 0 : i32
    %c0_i32_0 = arith.constant 0 : i32
    %c0_i32_1 = arith.constant 0 : i32
    return %c0_i32, %c0_i32_0 : i32, i32
  }
  func.func @transform_9(%arg0: i32) -> (i32, i32) {
    %c0_i32 = arith.constant 0 : i32
    %c0_i32_0 = arith.constant 0 : i32
    return %arg0, %c0_i32 : i32, i32
  }
}

</mosaic_0001>

<bundles_post_ra>
// kernel: network_forward.1
= control target key start
LH: loop header
LB: loop body
LE: loop exit
PB: predicated region body
PF: predicated region fallthrough
CT: control target
= control target key end

     0   :  { %vm299_vm0 = vcmask 1043456   ;;  %s1576_s0 = inlined_call_operand.vmem [shape: f32[2,256,36], index: 0, kind: input, shape index: {}]   ;;  %s1577_s1 = inlined_call_operand.vmem [shape: f32[36,128], index: 1, kind: input, shape index: {}]   ;;  %s1578_s2 = inlined_call_operand.vmem [shape: f32[1,128], index: 2, kind: input, shape index: {}]   ;;  %s1579_s3 = inlined_call_operand.vmem [shape: f32[128,128], index: 3, kind: input, shape index: {}]   ;;  %s1580_s4 = inlined_call_operand.vmem [shape: f32[1,128], index: 4, kind: input, shape index: {}]   ;;  %s1581_s5 = inlined_call_operand.vmem [shape: f32[128,128], index: 5, kind: input, shape index: {}]   ;;  %s1582_s6 = inlined_call_operand.vmem [shape: f32[1,128], index: 6, kind: input, shape index: {}]   ;;  %s1583_s7 = inlined_call_operand.vmem [shape: f32[128,128], index: 7, kind: input, shape index: {}]   ;;  %s1584_s8 = inlined_call_operand.vmem [shape: f32[1,128], index: 8, kind: input, shape index: {}]   ;;  %s1585_s9 = inlined_call_operand.hbm [shape: f32[2,128], index: 9, kind: output, shape index: {}]  }
   0x1   :  { %v101_v0 = vld [vmem:[%s1577_s1 + $0x20] sm:$0xf]  ;;  %v100_v1 = vld [vmem:[%s1577_s1 + $0x18] sm:$0xff]  ;;  %v99_v2 = vld [vmem:[%s1577_s1 + $0x10] sm:$0xff] }
   0x2   :  { %803 = vmatpush.msk.msra.mxu0 %vm299_vm0, %v101_v0  ;;  %868 = vmatpush.msk.msra.mxu1 %vm299_vm0, %v101_v0  ;;  %v98_v3 = vld [vmem:[%s1577_s1 + $0x8] sm:$0xff]  ;;  %v97_v4 = vld [vmem:[%s1577_s1] sm:$0xff] }
   0x3   :  { %869 = vmatpush.msk.msra.mxu2 %vm299_vm0, %v101_v0  ;;  %870 = vmatpush.msk.msra.mxu3 %vm299_vm0, %v101_v0 }
   0x4   :  { %315 = vmatpush.msra.mxu0 %v100_v1  ;;  %871 = vmatpush.msra.mxu1 %v100_v1 }
   0x5   :  { %872 = vmatpush.msra.mxu2 %v100_v1  ;;  %873 = vmatpush.msra.mxu3 %v100_v1 }
   0x6   :  { %316 = vmatpush.msra.mxu0 %v99_v2  ;;  %874 = vmatpush.msra.mxu1 %v99_v2 }
   0x7   :  { %875 = vmatpush.msra.mxu2 %v99_v2  ;;  %876 = vmatpush.msra.mxu3 %v99_v2 }
   0x8   :  { %14 = vsyncpa [#allocation3], 0  ;;  %317 = vmatpush.msra.mxu0 %v98_v3  ;;  %877 = vmatpush.msra.mxu1 %v98_v3  ;;  %v33_v5 = vld [vmem:[%s1576_s0] sm:$0xff]  ;;  %vm106_vm1 = vcmask 293888   ;;  %v52_v6 = vld [vmem:[%s1576_s0 + $0x98] sm:$0xff]  ;;  %vm681_vm3 = vcmask 1041409  }
   0x9   :  { %878 = vmatpush.msra.mxu2 %v98_v3  ;;  %879 = vmatpush.msra.mxu3 %v98_v3  ;;  %v69_v7 = vld [vmem:[%s1576_s0 + $0x120] sm:$0xff]  ;;  %v34_v8 = vld [vmem:[%s1576_s0 + $0x8] sm:$0xff]  ;;  %v35_v11 = vld [vmem:[%s1576_s0 + $0x10] sm:$0xff]  ;;  %s794_s18 = sshll.u32 %s1585_s9, 4  ;;  %s795_s18 = int_to_ptr.hbm [resolvable:$true] %s794_s18 }
   0xa   :  { %318 = vmatpush.msra.mxu0 %v97_v4  ;;  %880 = vmatpush.msra.mxu1 %v97_v4  ;;  %v53_v9 = vld [vmem:[%s1576_s0 + $0xa0] sm:$0xff]  ;;  %v70_v10 = vld [vmem:[%s1576_s0 + $0x128] sm:$0xff]  ;;  %v71_v13 = vld [vmem:[%s1576_s0 + $0x130] sm:$0xff] }
   0xb   :  { %804 = vmatmul.msk.f32.vlgmr.msra.gmra.mxu0 %vm106_vm1, %v33_v5  ;;  %823 = vmatmul.msk.f32.vlgmr.msra.gmra.mxu1 %vm106_vm1, %v52_v6  ;;  %v54_v12 = vld [vmem:[%s1576_s0 + $0xa8] sm:$0xff]  ;;  %v36_v14 = vld [vmem:[%s1576_s0 + $0x18] sm:$0xff]  ;;  %v55_v15 = vld [vmem:[%s1576_s0 + $0xb0] sm:$0xff] }
   0xc   :  { %881 = vmatpush.msra.mxu2 %v97_v4  ;;  %882 = vmatpush.msra.mxu3 %v97_v4  ;;  %v72_v16 = vld [vmem:[%s1576_s0 + $0x138] sm:$0xff]  ;;  %v37_v17 = vld [vmem:[%s1576_s0 + $0x20] sm:$0xff]  ;;  %v38_v20 = vld [vmem:[%s1576_s0 + $0x28] sm:$0xff] }
   0xd   :  { %840 = vmatmul.msk.f32.vlgmr.msra.gmra.mxu2 %vm106_vm1, %v69_v7  ;;  %v56_v18 = vld [vmem:[%s1576_s0 + $0xb8] sm:$0xff]  ;;  %v73_v19 = vld [vmem:[%s1576_s0 + $0x140] sm:$0xff]  ;;  %v74_v22 = vld [vmem:[%s1576_s0 + $0x148] sm:$0xff] }
   0xe   :  { %v57_v21 = vld [vmem:[%s1576_s0 + $0xc0] sm:$0xff]  ;;  %v39_v23 = vld [vmem:[%s1576_s0 + $0x30] sm:$0xff]  ;;  %v58_v24 = vld [vmem:[%s1576_s0 + $0xc8] sm:$0xff] }
   0xf   :  { %v75_v25 = vld [vmem:[%s1576_s0 + $0x150] sm:$0xff]  ;;  %v40_v26 = vld [vmem:[%s1576_s0 + $0x38] sm:$0xff]  ;;  %v85_v29 = vld [vmem:[%s1576_s0 + $0x1a0] sm:$0xff] }
  0x10   :  { %v59_v27 = vld [vmem:[%s1576_s0 + $0xd0] sm:$0xff]  ;;  %v76_v28 = vld [vmem:[%s1576_s0 + $0x158] sm:$0xff]  ;;  %856 = vmatmul.msk.f32.vlgmr.msra.gmra.mxu3 %vm106_vm1, %v85_v29  ;;  %v41_v30 = vld [vmem:[%s1576_s0 + $0x40] sm:$0xff] }
  0x11   :  { %v60_v31 = vld [vmem:[%s1576_s0 + $0xd8] sm:$0xff]  ;;  %v77_v32 = vld [vmem:[%s1576_s0 + $0x160] sm:$0xff]  ;;  %v86_v33 = vld [vmem:[%s1576_s0 + $0x1a8] sm:$0xff] }
  0x12   :  { %v42_v34 = vld [vmem:[%s1576_s0 + $0x48] sm:$0xff]  ;;  %v61_v35 = vld [vmem:[%s1576_s0 + $0xe0] sm:$0xff]  ;;  %v87_v37 = vld [vmem:[%s1576_s0 + $0x1b0] sm:$0xff] }
  0x13   :  { %805 = vmatmul.msk.f32.gmra.mxu0 %vm106_vm1, %v34_v8  ;;  %824 = vmatmul.msk.f32.gmra.mxu1 %vm106_vm1, %v53_v9  ;;  %v78_v36 = vld [vmem:[%s1576_s0 + $0x168] sm:$0xff]  ;;  %v43_v38 = vld [vmem:[%s1576_s0 + $0x50] sm:$0xff]  ;;  %v88_v41 = vld [vmem:[%s1576_s0 + $0x1b8] sm:$0xff] }
  0x14   :  { %v62_v39 = vld [vmem:[%s1576_s0 + $0xe8] sm:$0xff]  ;;  %v79_v40 = vld [vmem:[%s1576_s0 + $0x170] sm:$0xff]  ;;  %v44_v42 = vld [vmem:[%s1576_s0 + $0x58] sm:$0xff] }
  0x15   :  { %841 = vmatmul.msk.f32.gmra.mxu2 %vm106_vm1, %v70_v10  ;;  %v63_v43 = vld [vmem:[%s1576_s0 + $0xf0] sm:$0xff]  ;;  %v80_v44 = vld [vmem:[%s1576_s0 + $0x178] sm:$0xff]  ;;  %v89_v45 = vld [vmem:[%s1576_s0 + $0x1c0] sm:$0xff] }
  0x16   :  { %v45_v46 = vld [vmem:[%s1576_s0 + $0x60] sm:$0xff]  ;;  %v64_v47 = vld [vmem:[%s1576_s0 + $0xf8] sm:$0xff]  ;;  %v90_v49 = vld [vmem:[%s1576_s0 + $0x1c8] sm:$0xff] }
  0x17   :  { %v81_v48 = vld [vmem:[%s1576_s0 + $0x180] sm:$0xff]  ;;  %v46_v50 = vld [vmem:[%s1576_s0 + $0x68] sm:$0xff]  ;;  %v91_v53 = vld [vmem:[%s1576_s0 + $0x1d0] sm:$0xff] }
  0x18   :  { %857 = vmatmul.msk.f32.gmra.mxu3 %vm106_vm1, %v86_v33  ;;  %v65_v51 = vld [vmem:[%s1576_s0 + $0x100] sm:$0xff]  ;;  %v82_v52 = vld [vmem:[%s1576_s0 + $0x188] sm:$0xff]  ;;  %v47_v54 = vld [vmem:[%s1576_s0 + $0x70] sm:$0xff] }
  0x19   :  { %v66_v55 = vld [vmem:[%s1576_s0 + $0x108] sm:$0xff]  ;;  %v83_v56 = vld [vmem:[%s1576_s0 + $0x190] sm:$0xff]  ;;  %v92_v57 = vld [vmem:[%s1576_s0 + $0x1d8] sm:$0xff] }
  0x1a   :  { %v48_v58 = vld [vmem:[%s1576_s0 + $0x78] sm:$0xff]  ;;  %v67_v59 = vld [vmem:[%s1576_s0 + $0x110] sm:$0xff]  ;;  %v93_v61 = vld [vmem:[%s1576_s0 + $0x1e0] sm:$0xff] }
  0x1b   :  { %806 = vmatmul.msk.f32.gmra.mxu0 %vm106_vm1, %v35_v11  ;;  %825 = vmatmul.msk.f32.gmra.mxu1 %vm106_vm1, %v54_v12  ;;  %v84_v60 = vld [vmem:[%s1576_s0 + $0x198] sm:$0xff]  ;;  %v49_v0 = vld [vmem:[%s1576_s0 + $0x80] sm:$0xff]  ;;  %v94_v3 = vld [vmem:[%s1576_s0 + $0x1e8] sm:$0xff] }
  0x1c   :  { %v68_v1 = vld [vmem:[%s1576_s0 + $0x118] sm:$0xff]  ;;  %v1223_v2 = vld [vmem:[%s1578_s2] ss:$0 sm:$0xff]  ;;  %v50_v7 = vld [vmem:[%s1576_s0 + $0x88] sm:$0xff] }
  0x1d   :  { %842 = vmatmul.msk.f32.gmra.mxu2 %vm106_vm1, %v71_v13  ;;  %v95_v12 = vld [vmem:[%s1576_s0 + $0x1f0] sm:$0xff] }
  0x20   :  { %858 = vmatmul.msk.f32.gmra.mxu3 %vm106_vm1, %v87_v37 }
  0x23   :  { %807 = vmatmul.msk.f32.gmra.mxu0 %vm106_vm1, %v36_v14  ;;  %826 = vmatmul.msk.f32.gmra.mxu1 %vm106_vm1, %v55_v15 }
  0x25   :  { %843 = vmatmul.msk.f32.gmra.mxu2 %vm106_vm1, %v72_v16  ;;  %v51_v16 = vld [vmem:[%s1576_s0 + $0x90] sm:$0xff] }
  0x28   :  { %859 = vmatmul.msk.f32.gmra.mxu3 %vm106_vm1, %v88_v41  ;;  %v673_v41 = vld [vmem:[%s1579_s3 + $0x70] sm:$0xff] }
  0x2b   :  { %808 = vmatmul.msk.f32.gmra.mxu0 %vm106_vm1, %v37_v17  ;;  %827 = vmatmul.msk.f32.gmra.mxu1 %vm106_vm1, %v56_v18 }
  0x2d   :  { %844 = vmatmul.msk.f32.gmra.mxu2 %vm106_vm1, %v73_v19 }
  0x30   :  { %860 = vmatmul.msk.f32.gmra.mxu3 %vm106_vm1, %v89_v45 }
  0x33   :  { %809 = vmatmul.msk.f32.gmra.mxu0 %vm106_vm1, %v38_v20  ;;  %828 = vmatmul.msk.f32.gmra.mxu1 %vm106_vm1, %v57_v21  ;;  %v96_v20 = vld [vmem:[%s1576_s0 + $0x1f8] sm:$0xff]  ;;  %s918_s0 = smov [#allocation2]  }
  0x34   :  { %s792_s16 = sshll.u32 %s918_s0, 4  ;;  %s793_s16 = int_to_ptr.vmem [resolvable:$true] %s792_s16 }
  0x35   :  { %845 = vmatmul.msk.f32.gmra.mxu2 %vm106_vm1, %v74_v22 }
  0x38   :  { %861 = vmatmul.msk.f32.gmra.mxu3 %vm106_vm1, %v90_v49 }
  0x3b   :  { %810 = vmatmul.msk.f32.gmra.mxu0 %vm106_vm1, %v39_v23  ;;  %829 = vmatmul.msk.f32.gmra.mxu1 %vm106_vm1, %v58_v24 }
  0x3d   :  { %846 = vmatmul.msk.f32.gmra.mxu2 %vm106_vm1, %v75_v25 }
  0x40   :  { %862 = vmatmul.msk.f32.gmra.mxu3 %vm106_vm1, %v91_v53 }
  0x43   :  { %811 = vmatmul.msk.f32.gmra.mxu0 %vm106_vm1, %v40_v26  ;;  %830 = vmatmul.msk.f32.gmra.mxu1 %vm106_vm1, %v59_v27 }
  0x45   :  { %847 = vmatmul.msk.f32.gmra.mxu2 %vm106_vm1, %v76_v28 }
  0x48   :  { %863 = vmatmul.msk.f32.gmra.mxu3 %vm106_vm1, %v92_v57 }
  0x4b   :  { %812 = vmatmul.msk.f32.gmra.mxu0 %vm106_vm1, %v41_v30  ;;  %831 = vmatmul.msk.f32.gmra.mxu1 %vm106_vm1, %v60_v31 }
  0x4d   :  { %848 = vmatmul.msk.f32.gmra.mxu2 %vm106_vm1, %v77_v32 }
  0x50   :  { %864 = vmatmul.msk.f32.gmra.mxu3 %vm106_vm1, %v93_v61 }
  0x53   :  { %813 = vmatmul.msk.f32.gmra.mxu0 %vm106_vm1, %v42_v34  ;;  %832 = vmatmul.msk.f32.gmra.mxu1 %vm106_vm1, %v61_v35  ;;  %v674_v34 = vld [vmem:[%s1579_s3 + $0x78] sm:$0xff] }
  0x54   :  { %684 = vmatpush.msrb.mxu1 %v674_v34 }
  0x55   :  { %849 = vmatmul.msk.f32.gmra.mxu2 %vm106_vm1, %v78_v36 }
  0x56   :  { %685 = vmatpush.msrb.mxu1 %v673_v41 }
  0x58   :  { %865 = vmatmul.msk.f32.gmra.mxu3 %vm106_vm1, %v94_v3 }
  0x5b   :  { %814 = vmatmul.msk.f32.gmra.mxu0 %vm106_vm1, %v43_v38  ;;  %833 = vmatmul.msk.f32.gmra.mxu1 %vm106_vm1, %v62_v39 }
  0x5d   :  { %850 = vmatmul.msk.f32.gmra.mxu2 %vm106_vm1, %v79_v40 }
  0x60   :  { %866 = vmatmul.msk.f32.gmra.mxu3 %vm106_vm1, %v95_v12  ;;  %v668_v12 = vld [vmem:[%s1579_s3 + $0x48] sm:$0xff] }
  0x63   :  { %815 = vmatmul.msk.f32.gmra.mxu0 %vm106_vm1, %v44_v42  ;;  %834 = vmatmul.msk.f32.gmra.mxu1 %vm106_vm1, %v63_v43 }
  0x65   :  { %851 = vmatmul.msk.f32.gmra.mxu2 %vm106_vm1, %v80_v44 }
  0x68   :  { %867 = vmatmul.msk.f32.gmra.mxu3 %vm106_vm1, %v96_v20 }
  0x6b   :  { %816 = vmatmul.msk.f32.gmra.mxu0 %vm106_vm1, %v45_v46  ;;  %835 = vmatmul.msk.f32.gmra.mxu1 %vm106_vm1, %v64_v47 }
  0x6d   :  { %852 = vmatmul.msk.f32.gmra.mxu2 %vm106_vm1, %v81_v48  ;;  %v672_v48 = vld [vmem:[%s1579_s3 + $0x68] sm:$0xff] }
  0x6e   :  { %686 = vmatpush.msrb.mxu1 %v672_v48 }
  0x73   :  { %817 = vmatmul.msk.f32.gmra.mxu0 %vm106_vm1, %v46_v50  ;;  %836 = vmatmul.msk.f32.gmra.mxu1 %vm106_vm1, %v65_v51 }
  0x75   :  { %853 = vmatmul.msk.f32.gmra.mxu2 %vm106_vm1, %v82_v52 }
  0x7b   :  { %818 = vmatmul.msk.f32.gmra.mxu0 %vm106_vm1, %v47_v54  ;;  %837 = vmatmul.msk.f32.gmra.mxu1 %vm106_vm1, %v66_v55 }
  0x7d   :  { %854 = vmatmul.msk.f32.gmra.mxu2 %vm106_vm1, %v83_v56 }
  0x83   :  { %819 = vmatmul.msk.f32.gmra.mxu0 %vm106_vm1, %v48_v58  ;;  %838 = vmatmul.msk.f32.gmra.mxu1 %vm106_vm1, %v67_v59  ;;  %v671_v58 = vld [vmem:[%s1579_s3 + $0x60] sm:$0xff] }
  0x84   :  { %687 = vmatpush.msrb.mxu1 %v671_v58 }
  0x85   :  { %855 = vmatmul.msk.f32.gmra.mxu2 %vm106_vm1, %v84_v60 }
  0x88   :  { %v320_v62 = vpop.f32.mrf.mxu0  ;;  %v1212_v63 = vpop.f32.mrf.mxu1 }
  0x89   :  { %v321_v4 = vadd.f32 %v1223_v2, %v320_v62 }
  0x8b   :  { %820 = vmatmul.msk.f32.gmra.mxu0 %vm106_vm1, %v49_v0  ;;  %839 = vmatmul.msk.f32.gmra.mxu1 %vm106_vm1, %v68_v1  ;;  %v512_v8 = vmax.f32 %v321_v4, 0.0  ;;  %v670_v0 = vld [vmem:[%s1579_s3 + $0x58] sm:$0xff] }
  0x8c   :  { %688 = vmatpush.msrb.mxu1 %v670_v0 }
  0x90   :  { %v323_v5 = vpop.f32.mrf.mxu0  ;;  %v1232_v6 = vpop.f32.mrf.mxu1 }
  0x91   :  { %v324_v9 = vadd.f32 %v1223_v2, %v323_v5  ;;  %v1238_v10 = vpop.f32.mrf.mxu2  ;;  %v669_v5 = vld [vmem:[%s1579_s3 + $0x50] sm:$0xff] }
  0x92   :  { %689 = vmatpush.msrb.mxu1 %v669_v5 }
  0x93   :  { %v513_v11 = vmax.f32 %v324_v9, 0.0  ;;  %821 = vmatmul.msk.f32.gmra.mxu0 %vm106_vm1, %v50_v7  ;;  %v1294_v57 = vpop.f32.mrf.mxu3 }
  0x94   :  { %690 = vmatpush.msrb.mxu1 %v668_v12 }
  0x95   :  { %v576_v13 = vadd.f32 %v513_v11, %v512_v8 }
  0x98   :  { %v326_v14 = vpop.f32.mrf.mxu0  ;;  %v1245_v15 = vpop.f32.mrf.mxu1 }
  0x99   :  { %v327_v17 = vadd.f32 %v1223_v2, %v326_v14  ;;  %v1251_v18 = vpop.f32.mrf.mxu2 }
  0x9b   :  { %v514_v19 = vmax.f32 %v327_v17, 0.0  ;;  %822 = vmatmul.msk.f32.gmra.mxu0 %vm106_vm1, %v51_v16  ;;  %v1303_v62 = vpop.f32.mrf.mxu3 }
  0x9d   :  { %v577_v21 = vadd.f32 %v576_v13, %v514_v19 }
  0xa0   :  { %v329_v22 = vpop.f32.mrf.mxu0  ;;  %v1258_v23 = vpop.f32.mrf.mxu1 }
  0xa1   :  { %v330_v24 = vadd.f32 %v1223_v2, %v329_v22  ;;  %v1261_v25 = vpop.f32.mrf.mxu2 }
  0xa3   :  { %v515_v26 = vmax.f32 %v330_v24, 0.0  ;;  %v1315_v7 = vpop.f32.mrf.mxu3 }
  0xa5   :  { %v578_v27 = vadd.f32 %v577_v21, %v515_v26 }
  0xa8   :  { %v332_v28 = vpop.f32.mrf.mxu0  ;;  %v1263_v29 = vpop.f32.mrf.mxu1 }
  0xa9   :  { %v333_v30 = vadd.f32 %v1223_v2, %v332_v28  ;;  %v1266_v31 = vpop.f32.mrf.mxu2 }
  0xab   :  { %v516_v32 = vmax.f32 %v333_v30, 0.0  ;;  %v1326_v16 = vpop.f32.mrf.mxu3 }
  0xad   :  { %v579_v33 = vadd.f32 %v578_v27, %v516_v32 }
  0xb0   :  { %v335_v35 = vpop.f32.mrf.mxu0  ;;  %v1271_v36 = vpop.f32.mrf.mxu1 }
  0xb1   :  { %v336_v37 = vadd.f32 %v1223_v2, %v335_v35  ;;  %v1274_v39 = vpop.f32.mrf.mxu2 }
  0xb3   :  { %v517_v38 = vmax.f32 %v336_v37, 0.0  ;;  %v1330_v21 = vpop.f32.mrf.mxu3 }
  0xb5   :  { %v580_v40 = vadd.f32 %v579_v33, %v517_v38 }
  0xb8   :  { %v338_v42 = vpop.f32.mrf.mxu0  ;;  %v1279_v43 = vpop.f32.mrf.mxu1 }
  0xb9   :  { %v339_v44 = vadd.f32 %v1223_v2, %v338_v42  ;;  %v1282_v47 = vpop.f32.mrf.mxu2 }
  0xbb   :  { %v518_v45 = vmax.f32 %v339_v44, 0.0  ;;  %v1334_v27 = vpop.f32.mrf.mxu3  ;;  %v667_v44 = vld [vmem:[%s1579_s3 + $0x40] sm:$0xff] }
  0xbc   :  { %691 = vmatpush.msrb.mxu1 %v667_v44 }
  0xbd   :  { %v581_v46 = vadd.f32 %v580_v40, %v518_v45 }
  0xc0   :  { %v341_v49 = vpop.f32.mrf.mxu0  ;;  %v1287_v50 = vpop.f32.mrf.mxu1 }
  0xc1   :  { %v342_v51 = vadd.f32 %v1223_v2, %v341_v49  ;;  %v1290_v54 = vpop.f32.mrf.mxu2 }
  0xc3   :  { %v519_v52 = vmax.f32 %v342_v51, 0.0  ;;  %v666_v51 = vld [vmem:[%s1579_s3 + $0x38] sm:$0xff] }
  0xc4   :  { %692 = vmatpush.msrb.mxu1 %v666_v51 }
  0xc5   :  { %v582_v53 = vadd.f32 %v581_v46, %v519_v52  ;;  %v1351_v52 = vpop.f32.mrf.mxu3 }
  0xc8   :  { %v344_v55 = vpop.f32.mrf.mxu0  ;;  %v1292_v56 = vpop.f32.mrf.mxu1 }
  0xc9   :  { %v1301_v61 = vpop.f32.mrf.mxu2  ;;  %v345_v28 = vadd.f32 %v1223_v2, %v344_v55  ;;  %v429_v55 = vadd.f32 %v1223_v2, %v1238_v10 }
  0xcb   :  { %v520_v38 = vmax.f32 %v345_v28, 0.0  ;;  %v548_v10 = vmax.f32 %v429_v55, 0.0 }
  0xcd   :  { %v583_v58 = vadd.f32 %v582_v53, %v520_v38  ;;  %v435_v53 = vadd.f32 %v1223_v2, %v1261_v25  ;;  %v665_v25 = vld [vmem:[%s1579_s3 + $0x30] sm:$0xff] }
  0xce   :  { %693 = vmatpush.msrb.mxu1 %v665_v25 }
  0xd0   :  { %v347_v59 = vpop.f32.mrf.mxu0  ;;  %v1299_v60 = vpop.f32.mrf.mxu1 }
  0xd1   :  { %v1310_v4 = vpop.f32.mrf.mxu2  ;;  %v348_v34 = vadd.f32 %v1223_v2, %v347_v59 }
  0xd3   :  { %v521_v45 = vmax.f32 %v348_v34, 0.0 }
  0xd8   :  { %v350_v1 = vpop.f32.mrf.mxu0  ;;  %v1308_v3 = vpop.f32.mrf.mxu1 }
  0xd9   :  { %v1319_v11 = vpop.f32.mrf.mxu2  ;;  %v351_v41 = vadd.f32 %v1223_v2, %v350_v1 }
  0xdb   :  { %v522_v1 = vmax.f32 %v351_v41, 0.0 }
  0xe0   :  { %v353_v8 = vpop.f32.mrf.mxu0  ;;  %v1317_v9 = vpop.f32.mrf.mxu1 }
  0xe1   :  { %v1328_v17 = vpop.f32.mrf.mxu2  ;;  %v354_v46 = vadd.f32 %v1223_v2, %v353_v8 }
  0xe3   :  { %v523_v28 = vmax.f32 %v354_v46, 0.0 }
  0xe8   :  { %v356_v13 = vpop.f32.mrf.mxu0  ;;  %v1324_v14 = vpop.f32.mrf.mxu1 }
  0xe9   :  { %v1332_v26 = vpop.f32.mrf.mxu2  ;;  %v357_v5 = vadd.f32 %v1223_v2, %v356_v13 }
  0xf0   :  { %v359_v19 = vpop.f32.mrf.mxu0  ;;  %v416_v20 = vpop.f32.mrf.mxu1 }
  0xf1   :  { %v417_v35 = vadd.f32 %v1223_v2, %v416_v20  ;;  %v1341_v40 = vpop.f32.mrf.mxu2  ;;  %v432_v20 = vadd.f32 %v1223_v2, %v1251_v18 }
  0xf3   :  { %v544_v48 = vmax.f32 %v417_v35, 0.0  ;;  %v549_v41 = vmax.f32 %v432_v20, 0.0 }
  0xf8   :  { %v362_v22 = vpop.f32.mrf.mxu0  ;;  %v419_v24 = vpop.f32.mrf.mxu1 }
  0xf9   :  { %v420_v33 = vadd.f32 %v1223_v2, %v419_v24  ;;  %v584_v24 = vadd.f32 %v583_v58, %v521_v45  ;;  %v363_v13 = vadd.f32 %v1223_v2, %v362_v22  ;;  %v1365_v18 = vpop.f32.mrf.mxu2  ;;  %v664_v22 = vld [vmem:[%s1579_s3 + $0x28] sm:$0xff] }
  0xfa   :  { %694 = vmatpush.msrb.mxu1 %v664_v22 }
  0xfb   :  { %v545_v42 = vmax.f32 %v420_v33, 0.0  ;;  %v585_v35 = vadd.f32 %v584_v24, %v522_v1  ;;  %v526_v55 = vmax.f32 %v363_v13, 0.0  ;;  %v444_v1 = vadd.f32 %v1223_v2, %v1282_v47 }
  0xfd   :  { %v613_v12 = vadd.f32 %v545_v42, %v544_v48  ;;  %v438_v42 = vadd.f32 %v1223_v2, %v1266_v31  ;;  %v586_v44 = vadd.f32 %v585_v35, %v523_v28  ;;  %v550_v48 = vmax.f32 %v435_v53, 0.0 }
 0x100   :  { %v365_v30 = vpop.f32.mrf.mxu0  ;;  %v422_v32 = vpop.f32.mrf.mxu1 }
 0x101   :  { %v423_v37 = vadd.f32 %v1223_v2, %v422_v32  ;;  %v360_v32 = vadd.f32 %v1223_v2, %v359_v19  ;;  %v366_v19 = vadd.f32 %v1223_v2, %v365_v30 }
 0x103   :  { %v546_v49 = vmax.f32 %v423_v37, 0.0  ;;  %v524_v37 = vmax.f32 %v357_v5, 0.0  ;;  %v525_v45 = vmax.f32 %v360_v32, 0.0  ;;  %v1379_v5 = vpop.f32.mrf.mxu3 }
 0x105   :  { %v614_v33 = vadd.f32 %v613_v12, %v546_v49  ;;  %v441_v49 = vadd.f32 %v1223_v2, %v1274_v39  ;;  %v587_v51 = vadd.f32 %v586_v44, %v524_v37  ;;  %v447_v39 = vadd.f32 %v1223_v2, %v1290_v54 }
 0x106   :  { %v378_v37 = vadd.f32 %v1223_v2, %v1212_v63  ;;  %v453_v54 = vadd.f32 %v1223_v2, %v1310_v4 }
 0x107   :  { %v588_v12 = vadd.f32 %v587_v51, %v525_v45  ;;  %v552_v28 = vmax.f32 %v441_v49, 0.0  ;;  %v554_v13 = vmax.f32 %v447_v39, 0.0  ;;  %v384_v49 = vadd.f32 %v1223_v2, %v1245_v15  ;;  %v663_v15 = vld [vmem:[%s1579_s3 + $0x20] sm:$0xff] }
 0x108   :  { %v368_v59 = vpop.f32.mrf.mxu0  ;;  %v425_v0 = vpop.f32.mrf.mxu1  ;;  %v556_v4 = vmax.f32 %v453_v54, 0.0  ;;  %v459_v51 = vadd.f32 %v1223_v2, %v1328_v17  ;;  %v465_v17 = vadd.f32 %v1223_v2, %v1341_v40  ;;  %695 = vmatpush.msrb.mxu1 %v663_v15  ;;  %v468_v40 = vadd.f32 %v1223_v2, %v1365_v18 }
 0x109   :  { %v426_v8 = vadd.f32 %v1223_v2, %v425_v0  ;;  %v369_v58 = vadd.f32 %v1223_v2, %v368_v59  ;;  %v551_v0 = vmax.f32 %v438_v42, 0.0  ;;  %v589_v32 = vadd.f32 %v588_v12, %v526_v55 }
 0x10a   :  { %v399_v18 = vadd.f32 %v1223_v2, %v1287_v50  ;;  %v480_v50 = vadd.f32 %v1223_v2, %v1303_v62  ;;  %v486_v62 = vadd.f32 %v1223_v2, %v1326_v16  ;;  %v489_v16 = vadd.f32 %v1223_v2, %v1330_v21  ;;  %v720_v21 = vld [vmem:[%s1581_s5 + $0x78] sm:$0xff] }
 0x10b   :  { %v547_v34 = vmax.f32 %v426_v8, 0.0  ;;  %v527_v8 = vmax.f32 %v366_v19, 0.0  ;;  %725 = vmatpush.msrb.mxu2 %v720_v21  ;;  %v756_v21 = vld [vmem:[%s1583_s7 + $0x50] sm:$0xff] }
 0x10d   :  { %v615_v38 = vadd.f32 %v614_v33, %v547_v34  ;;  %v528_v33 = vmax.f32 %v369_v58, 0.0  ;;  %v450_v34 = vadd.f32 %v1223_v2, %v1301_v61  ;;  %v590_v47 = vadd.f32 %v589_v32, %v527_v8 }
 0x10e   :  { %v381_v61 = vadd.f32 %v1223_v2, %v1232_v6  ;;  %v390_v8 = vadd.f32 %v1223_v2, %v1263_v29  ;;  %v393_v32 = vadd.f32 %v1223_v2, %v1271_v36 }
 0x10f   :  { %v616_v46 = vadd.f32 %v615_v38, %v548_v10  ;;  %v553_v10 = vmax.f32 %v444_v1, 0.0  ;;  %v591_v42 = vadd.f32 %v590_v47, %v528_v33  ;;  %v555_v19 = vmax.f32 %v450_v34, 0.0 }
 0x110   :  { %v371_v31 = vpop.f32.mrf.mxu0  ;;  %v532_v6 = vmax.f32 %v381_v61, 0.0  ;;  %v535_v47 = vmax.f32 %v390_v8, 0.0  ;;  %v536_v54 = vmax.f32 %v393_v32, 0.0  ;;  %v561_v61 = vmax.f32 %v468_v40, 0.0 }
 0x111   :  { %v617_v30 = vadd.f32 %v616_v46, %v549_v41  ;;  %v372_v24 = vadd.f32 %v1223_v2, %v371_v31  ;;  %v470_v41 = vpop.f32.mrf.mxu2  ;;  %v456_v46 = vadd.f32 %v1223_v2, %v1319_v11  ;;  %v1397_v31 = vpop.f32.mrf.mxu3  ;;  %v414_v8 = vadd.f32 %v1223_v2, %v1324_v14 }
 0x112   :  { %v495_v14 = vadd.f32 %v1223_v2, %v1351_v52  ;;  %v718_v52 = vld [vmem:[%s1581_s5 + $0x68] sm:$0xff] }
 0x113   :  { %v618_v20 = vadd.f32 %v617_v30, %v550_v48  ;;  %v529_v35 = vmax.f32 %v372_v24, 0.0  ;;  %v531_v48 = vmax.f32 %v378_v37, 0.0  ;;  %v387_v30 = vadd.f32 %v1223_v2, %v1258_v23 }
 0x114   :  { %v557_v11 = vmax.f32 %v456_v46, 0.0  ;;  %v558_v24 = vmax.f32 %v459_v51, 0.0  ;;  %v477_v46 = vadd.f32 %v1223_v2, %v1294_v57  ;;  %v483_v57 = vadd.f32 %v1223_v2, %v1315_v7  ;;  %v659_v7 = vld [vmem:[%s1579_s3] sm:$0xff] }
 0x115   :  { %v619_v59 = vadd.f32 %v618_v20, %v551_v0  ;;  %v592_v22 = vadd.f32 %v591_v42, %v529_v35  ;;  %v462_v0 = vadd.f32 %v1223_v2, %v1332_v26  ;;  %v533_v20 = vmax.f32 %v384_v49, 0.0  ;;  %v662_v26 = vld [vmem:[%s1579_s3 + $0x18] sm:$0xff] }
 0x116   :  { %696 = vmatpush.msrb.mxu1 %v662_v26  ;;  %v560_v35 = vmax.f32 %v465_v17, 0.0  ;;  %v538_v49 = vmax.f32 %v399_v18, 0.0  ;;  %v567_v26 = vmax.f32 %v486_v62, 0.0  ;;  %v710_v62 = vld [vmem:[%s1581_s5 + $0x28] sm:$0xff] }
 0x117   :  { %v620_v53 = vadd.f32 %v619_v59, %v552_v28  ;;  %v534_v28 = vmax.f32 %v387_v30, 0.0  ;;  %v559_v59 = vmax.f32 %v462_v0, 0.0  ;;  %v565_v0 = vmax.f32 %v480_v50, 0.0  ;;  %v714_v50 = vld [vmem:[%s1581_s5 + $0x48] sm:$0xff] }
 0x118   :  { %v374_v38 = vpop.f32.mrf.mxu0 }
 0x119   :  { %v621_v44 = vadd.f32 %v620_v53, %v553_v10  ;;  %v375_v45 = vadd.f32 %v1223_v2, %v374_v38  ;;  %v473_v33 = vpop.f32.mrf.mxu2  ;;  %v661_v10 = vld [vmem:[%s1579_s3 + $0x10] sm:$0xff]  ;;  %v396_v53 = vadd.f32 %v1223_v2, %v1279_v43  ;;  %v1426_v42 = vpop.f32.mrf.mxu3  ;;  %v402_v43 = vadd.f32 %v1223_v2, %v1292_v56 }
 0x11a   :  { %697 = vmatpush.msrb.mxu1 %v661_v10  ;;  %v474_v38 = vadd.f32 %v1223_v2, %v473_v33  ;;  %v408_v56 = vadd.f32 %v1223_v2, %v1308_v3  ;;  %v660_v3 = vld [vmem:[%s1579_s3 + $0x8] sm:$0xff]  ;;  %v543_v33 = vmax.f32 %v414_v8, 0.0  ;;  %v498_v10 = vadd.f32 %v1223_v2, %v1379_v5  ;;  %v717_v5 = vld [vmem:[%s1581_s5 + $0x60] sm:$0xff]  ;;  %v708_v8 = vld [vmem:[%s1581_s5 + $0x18] sm:$0xff] }
 0x11b   :  { %v622_v25 = vadd.f32 %v621_v44, %v554_v13  ;;  %v530_v63 = vmax.f32 %v375_v45, 0.0  ;;  %v471_v13 = vadd.f32 %v1223_v2, %v470_v41 }
 0x11c   :  { %v541_v15 = vmax.f32 %v408_v56, 0.0  ;;  %698 = vmatpush.msrb.mxu1 %v660_v3 }
 0x11d   :  { %v623_v55 = vadd.f32 %v622_v25, %v555_v19  ;;  %v593_v58 = vadd.f32 %v592_v22, %v530_v63  ;;  %v537_v19 = vmax.f32 %v396_v53, 0.0  ;;  %v562_v22 = vmax.f32 %v471_v13, 0.0 }
 0x11e   :  { %v563_v63 = vmax.f32 %v474_v38, 0.0  ;;  %699 = vmatpush.msrb.mxu1 %v659_v7 }
 0x11f   :  { %v624_v1 = vadd.f32 %v623_v55, %v556_v4  ;;  %v594_v12 = vadd.f32 %v593_v58, %v531_v48  ;;  %v405_v48 = vadd.f32 %v1223_v2, %v1299_v60  ;;  %v539_v55 = vmax.f32 %v402_v43, 0.0 }
 0x120   :  { %v564_v58 = vmax.f32 %v477_v46, 0.0  ;;  %v411_v60 = vadd.f32 %v1223_v2, %v1317_v9  ;;  %v566_v9 = vmax.f32 %v483_v57, 0.0  ;;  %v712_v57 = vld [vmem:[%s1581_s5 + $0x38] sm:$0xff] }
 0x121   :  { %v625_v23 = vadd.f32 %v624_v1, %v557_v11  ;;  %v595_v39 = vadd.f32 %v594_v12, %v532_v6  ;;  %v540_v11 = vmax.f32 %v405_v48, 0.0  ;;  %v506_v17 = vpop.f32.mrf.mxu3 }
 0x122   :  { %v507_v46 = vadd.f32 %v1223_v2, %v506_v17 }
 0x123   :  { %v626_v29 = vadd.f32 %v625_v23, %v558_v24  ;;  %v596_v34 = vadd.f32 %v595_v39, %v533_v20  ;;  %v492_v23 = vadd.f32 %v1223_v2, %v1334_v27  ;;  %v542_v39 = vmax.f32 %v411_v60, 0.0  ;;  %v719_v27 = vld [vmem:[%s1581_s5 + $0x70] sm:$0xff] }
 0x124   :  { %726 = vmatpush.msrb.mxu2 %v719_v27  ;;  %v755_v27 = vld [vmem:[%s1583_s7 + $0x48] sm:$0xff] }
 0x125   :  { %v627_v37 = vadd.f32 %v626_v29, %v559_v59  ;;  %v597_v36 = vadd.f32 %v596_v34, %v534_v28  ;;  %v568_v59 = vmax.f32 %v489_v16, 0.0  ;;  %v569_v40 = vmax.f32 %v492_v23, 0.0  ;;  %v706_v23 = vld [vmem:[%s1581_s5 + $0x8] sm:$0xff] }
 0x126   :  { %727 = vmatpush.msrb.mxu2 %v718_v52  ;;  %v750_v52 = vld [vmem:[%s1583_s7 + $0x20] sm:$0xff] }
 0x127   :  { %v628_v44 = vadd.f32 %v627_v37, %v560_v35  ;;  %v598_v45 = vadd.f32 %v597_v36, %v535_v47  ;;  %v917_v35 = vmov 256.0   ;;  %v570_v37 = vmax.f32 %v495_v14, 0.0  ;;  %v760_v14 = vld [vmem:[%s1583_s7 + $0x70] sm:$0xff] }
 0x128   :  { %889 = vrcp.f32 %v917_v35  ;;  %v501_v36 = vadd.f32 %v1223_v2, %v1397_v31  ;;  %728 = vmatpush.msrb.mxu2 %v717_v5  ;;  %v751_v35 = vld [vmem:[%s1583_s7 + $0x28] sm:$0xff] }
 0x129   :  { %v599_v25 = vadd.f32 %v598_v45, %v536_v54  ;;  %v629_v41 = vadd.f32 %v628_v44, %v561_v61  ;;  %v509_v38 = vpop.f32.mrf.mxu3  ;;  %v571_v54 = vmax.f32 %v498_v10, 0.0  ;;  %v504_v44 = vadd.f32 %v1223_v2, %v1426_v42  ;;  %v716_v61 = vld [vmem:[%s1581_s5 + $0x58] sm:$0xff]  ;;  %v754_v10 = vld [vmem:[%s1583_s7 + $0x40] sm:$0xff] }
 0x12a   :  { %v572_v31 = vmax.f32 %v501_v36, 0.0  ;;  %729 = vmatpush.msrb.mxu2 %v716_v61  ;;  %v886_v36 = vld [vmem:[%s1580_s4] ss:$0 sm:$0xff] }
 0x12b   :  { %v600_v4 = vadd.f32 %v599_v25, %v537_v19  ;;  %v630_v51 = vadd.f32 %v629_v41, %v562_v22  ;;  %v510_v25 = vadd.f32 %v1223_v2, %v509_v38  ;;  %v715_v41 = vld [vmem:[%s1581_s5 + $0x50] sm:$0xff]  ;;  %v573_v42 = vmax.f32 %v504_v44, 0.0  ;;  %v713_v2 = vld [vmem:[%s1581_s5 + $0x40] sm:$0xff]  ;;  %v747_v38 = vld [vmem:[%s1583_s7 + $0x8] sm:$0xff] }
 0x12c   :  { %730 = vmatpush.msrb.mxu2 %v715_v41 }
 0x12d   :  { %v601_v6 = vadd.f32 %v600_v4, %v538_v49  ;;  %v631_v30 = vadd.f32 %v630_v51, %v563_v63  ;;  %v574_v4 = vmax.f32 %v507_v46, 0.0  ;;  %v575_v51 = vmax.f32 %v510_v25, 0.0 }
 0x12e   :  { %v890_v19 = vpop.eup %889  ;;  %731 = vmatpush.msrb.mxu2 %v714_v50 }
 0x12f   :  { %v602_v1 = vadd.f32 %v601_v6, %v539_v55  ;;  %v632_v12 = vadd.f32 %v631_v30, %v564_v58  ;;  %v651_v48 = vmul.f32 256.0, %v890_v19  ;;  %v711_v30 = vld [vmem:[%s1581_s5 + $0x30] sm:$0xff]  ;;  %vm655_vm2 = vweird.f32 %v890_v19 }
 0x130   :  { %732 = vmatpush.msrb.mxu2 %v713_v2 }
 0x131   :  { %v633_v20 = vadd.f32 %v632_v12, %v565_v0  ;;  %v603_v24 = vadd.f32 %v602_v1, %v540_v11  ;;  %v652_v58 = vsub.f32 1.0, %v651_v48  ;;  %v709_v12 = vld [vmem:[%s1581_s5 + $0x20] sm:$0xff] }
 0x132   :  { %733 = vmatpush.msrb.mxu2 %v712_v57 }
 0x133   :  { %v634_v28 = vadd.f32 %v633_v20, %v566_v9  ;;  %v604_v32 = vadd.f32 %v603_v24, %v541_v15  ;;  %v653_v60 = vmul.f32 %v890_v19, %v652_v58  ;;  %v707_v9 = vld [vmem:[%s1581_s5 + $0x10] sm:$0xff] }
 0x134   :  { %734 = vmatpush.msrb.mxu2 %v711_v30 }
 0x135   :  { %v635_v29 = vadd.f32 %v634_v28, %v567_v26  ;;  %v605_v34 = vadd.f32 %v604_v32, %v542_v39  ;;  %v654_v15 = vadd.f32 %v890_v19, %v653_v60  ;;  %v705_v26 = vld [vmem:[%s1581_s5] sm:$0xff] }
 0x136   :  { %735 = vmatpush.msrb.mxu2 %v710_v62 }
 0x137   :  { %v636_v47 = vadd.f32 %v635_v29, %v568_v59  ;;  %v606_v53 = vadd.f32 %v605_v34, %v543_v33  ;;  %v656_v24 = vsel %vm655_vm2, %v890_v19, %v654_v15  ;;  %v761_v59 = vld [vmem:[%s1583_s7 + $0x78] sm:$0xff]  ;;  %v759_v29 = vld [vmem:[%s1583_s7 + $0x68] sm:$0xff]  ;;  %v758_v34 = vld [vmem:[%s1583_s7 + $0x60] sm:$0xff] }
 0x138   :  { %736 = vmatpush.msrb.mxu2 %v709_v12  ;;  %766 = vmatpush.msrb.mxu3 %v761_v59 }
 0x139   :  { %v637_v13 = vadd.f32 %v636_v47, %v569_v40  ;;  %v607_v45 = vrot.slane %v606_v53, 4  ;;  %v757_v40 = vld [vmem:[%s1583_s7 + $0x58] sm:$0xff] }
 0x13a   :  { %737 = vmatpush.msrb.mxu2 %v708_v8  ;;  %767 = vmatpush.msrb.mxu3 %v760_v14  ;;  %v753_v47 = vld [vmem:[%s1583_s7 + $0x38] sm:$0xff] }
 0x13b   :  { %v638_v18 = vadd.f32 %v637_v13, %v570_v37  ;;  %v608_v63 = vadd.f32 %v607_v45, %v606_v53  ;;  %v752_v53 = vld [vmem:[%s1583_s7 + $0x30] sm:$0xff]  ;;  %v749_v37 = vld [vmem:[%s1583_s7 + $0x18] sm:$0xff]  ;;  %v887_v45 = vld [vmem:[%s1582_s6] ss:$0 sm:$0xff] }
 0x13c   :  { %738 = vmatpush.msrb.mxu2 %v707_v9  ;;  %768 = vmatpush.msrb.mxu3 %v759_v29  ;;  %v748_v13 = vld [vmem:[%s1583_s7 + $0x10] sm:$0xff] }
 0x13d   :  { %v639_v43 = vadd.f32 %v638_v18, %v571_v54  ;;  %v609_v56 = vrot.slane %v608_v63, 2  ;;  %v746_v18 = vld [vmem:[%s1583_s7] sm:$0xff] }
 0x13e   :  { %739 = vmatpush.msrb.mxu2 %v706_v23  ;;  %769 = vmatpush.msrb.mxu3 %v758_v34 }
 0x13f   :  { %v640_v22 = vadd.f32 %v639_v43, %v572_v31  ;;  %v610_v0 = vadd.f32 %v609_v56, %v608_v63  ;;  %v888_v43 = vld [vmem:[%s1584_s8] ss:$0 sm:$0xff] }
 0x140   :  { %740 = vmatpush.msrb.mxu2 %v705_v26  ;;  %770 = vmatpush.msrb.mxu3 %v757_v40 }
 0x141   :  { %v641_v49 = vadd.f32 %v640_v22, %v573_v42  ;;  %v611_v7 = vrot.slane %v610_v0, 1 }
 0x142   :  { %771 = vmatpush.msrb.mxu3 %v756_v21 }
 0x143   :  { %v642_v55 = vadd.f32 %v641_v49, %v574_v4  ;;  %v612_v20 = vadd.f32 %v611_v7, %v610_v0 }
 0x144   :  { %772 = vmatpush.msrb.mxu3 %v755_v27 }
 0x145   :  { %v643_v6 = vadd.f32 %v642_v55, %v575_v51  ;;  %v657_v28 = vmul.f32 %v656_v24, %v612_v20 }
 0x146   :  { %773 = vmatpush.msrb.mxu3 %v754_v10 }
 0x147   :  { %v644_v11 = vrot.slane %v643_v6, 4 }
 0x148   :  { %774 = vmatpush.msrb.mxu3 %v753_v47 }
 0x149   :  { %v645_v1 = vadd.f32 %v644_v11, %v643_v6 }
 0x14a   :  { %775 = vmatpush.msrb.mxu3 %v752_v53 }
 0x14b   :  { %v646_v3 = vrot.slane %v645_v1, 2 }
 0x14c   :  { %776 = vmatpush.msrb.mxu3 %v751_v35 }
 0x14d   :  { %v647_v17 = vadd.f32 %v646_v3, %v645_v1 }
 0x14e   :  { %777 = vmatpush.msrb.mxu3 %v750_v52 }
 0x14f   :  { %v648_v16 = vrot.slane %v647_v17, 1 }
 0x150   :  { %778 = vmatpush.msrb.mxu3 %v749_v37 }
 0x151   :  { %v649_v39 = vadd.f32 %v648_v16, %v647_v17 }
 0x152   :  { %779 = vmatpush.msrb.mxu3 %v748_v13 }
 0x153   :  { %v658_v32 = vmul.f32 %v656_v24, %v649_v39 }
 0x154   :  { %780 = vmatpush.msrb.mxu3 %v747_v38 }
 0x155   :  { %v682_v33 = vsel %vm681_vm3, %v658_v32, %v657_v28 }
 0x156   :  { %700 = vmatmul.f32.vlgmr.msrb.gmra.mxu1 %v682_v33  ;;  %781 = vmatpush.msrb.mxu3 %v746_v18 }
 0x1d3   :  { %v701_v5 = vpop.f32.mrf.mxu1 }
 0x1d4   :  { %v702_v54 = vadd.f32 %v886_v36, %v701_v5 }
 0x1d6   :  { %v704_v44 = vmax.f32 %v702_v54, 0.0 }
 0x1d8   :  { %741 = vmatmul.f32.vlgmr.msrb.gmra.mxu2 %v704_v44 }
 0x25b   :  { %v742_v61 = vpop.f32.mrf.mxu2 }
 0x25c   :  { %v743_v19 = vadd.f32 %v887_v45, %v742_v61 }
 0x25e   :  { %v745_v31 = vmax.f32 %v743_v19, 0.0 }
 0x260   :  { %782 = vmatmul.f32.vlgmr.msrb.gmra.mxu3 %v745_v31 }
 0x2e3   :  { %v783_v46 = vpop.f32.mrf.mxu3 }
 0x2e4   :  { %v784_v25 = vadd.f32 %v888_v43, %v783_v46 }
 0x2e6   :  { %786 = vst [vmem:[#allocation2] sm:$0x3] %v784_v25 }
 0x2e7   :  { %797 = dma.vmem_to_hbm [thread:$0]  %s793_s16, 32, %s795_s18, [#allocation3]  }
 0x2e8   :  { %915 = dma.done.wait [#allocation3], 32  }
 0x2e9   :  { %916 = vsyncadd [#allocation3], 4294967264 }
 0x2ea   :  { %802 = vsyncpa [#allocation3], 1 }

</bundles_post_ra>
